<compile_context>
chip_gen: v7x
topology: tpu7x:2x2x1
jax: 0.10.0
libtpu: 0.0.40
codegen_flags: <defaults>
</compile_context>

<pallas_src>
import jax
import jax.numpy as jnp
from jax.experimental import pallas as pl
from jax.experimental.pallas import tpu as pltpu


# ----------------------------------------------------------------------------
# Kernels
# ----------------------------------------------------------------------------
def _logreg_kernel_single(x_ref, w_ref, b_ref, o_ref):
    # x_ref: (TB, D) f32, w_ref: (D, C_pad) bf16, b_ref: (1, C_pad) f32,
    # o_ref: (TB, C_pad) f32.  One MXU call + stable softmax, no K loop.
    logits = jnp.dot(
        x_ref[...].astype(jnp.bfloat16), w_ref[...],
        preferred_element_type=jnp.float32,
    ) + b_ref[...]
    m = jnp.max(logits, axis=-1, keepdims=True)
    e = jnp.exp(logits - m)
    denom = jnp.sum(e, axis=-1, keepdims=True)
    o_ref[...] = (e * pl.reciprocal(denom, approx=True)).astype(o_ref.dtype)


def _logreg_kernel_ktiled(x_ref, w_ref, b_ref, o_ref):
    # x_ref: (TB, TK) f32, w_ref: (TK, C_pad) bf16, b_ref: (1, C_pad) f32,
    # o_ref: (TB, C_pad) f32 (same block across the K axis -> acts as the
    # accumulator; no VMEM scratch needed).
    k = pl.program_id(1)

    @pl.when(k == 0)
    def _():
        o_ref[...] = jnp.zeros_like(o_ref)

    o_ref[...] += jnp.dot(
        x_ref[...].astype(jnp.bfloat16), w_ref[...],
        preferred_element_type=jnp.float32,
    )

    @pl.when(k == pl.num_programs(1) - 1)
    def _():
        logits = o_ref[...] + b_ref[...]
        m = jnp.max(logits, axis=-1, keepdims=True)
        e = jnp.exp(logits - m)
        denom = jnp.sum(e, axis=-1, keepdims=True)
        o_ref[...] = (e * pl.reciprocal(denom, approx=True)).astype(o_ref.dtype)


# ----------------------------------------------------------------------------
# Wrapper
# ----------------------------------------------------------------------------
def _vmem_limit_bytes():
    try:
        cap = int(pltpu.get_tpu_info().vmem_capacity_bytes)
    except Exception:
        cap = 64 * 1024 * 1024  # conservative (v7x) fallback
    return int(0.7 * cap)


def _round_up(n, m):
    return ((n + m - 1) // m) * m


def logistic_regression_forward(x, w, b, *, block_b=None, block_k=None):
    """x: [B, D] f32, w: [D, C] f32 (nn.Linear.weight.T), b: [C] f32 -> [B, C] f32."""
    B, D = x.shape
    Dw, C = w.shape
    assert D == Dw and b.shape == (C,)

    C_pad = _round_up(max(C, 128), 128)          # lane-dense output
    vmem_limit = _vmem_limit_bytes()
    operand_budget = int(0.8 * vmem_limit)
    # ~4 MiB of x per grid step; ~8 MiB on v7x (smaller VMEM => faster HBM gen,
    # where the fixed ~0.35 us per-step overhead is twice as costly).
    target_x_bytes = (8 if vmem_limit < 64 * 1024 * 1024 else 4) * 1024 * 1024

    # --- batch tile -----------------------------------------------------------
    if block_b is None:
        ub = max(8, target_x_bytes // (D * 4))   # x tile is f32 in VMEM
        if B >= 16:
            # guarantee >= 2 batch tiles so both v7x TensorCores are used
            ub = min(ub, max(8, (B // 2) // 8 * 8))
        else:
            ub = min(ub, _round_up(B, 8))
        block_b = 8
        for c in (2048, 1024, 512, 256, 128, 64, 32, 16, 8):
            if c <= ub:
                block_b = c
                break
    B_pad = _round_up(B, block_b)

    # --- feature (reduction) tile --------------------------------------------
    if block_k is None:
        # Single-K whenever double-buffered x (f32) + W (bf16) + out (f32) fit.
        single_k_bytes = (2 * block_b * D * 4
                          + 2 * D * C_pad * 2
                          + 2 * block_b * C_pad * 4)
        if single_k_bytes <= operand_budget:
            block_k = D
        else:
            block_k = 128
            for c in (4096, 2048, 1024, 512, 256, 128):
                tile_bytes = (2 * block_b * c * 4
                              + 2 * c * C_pad * 2
                              + 2 * block_b * C_pad * 4)
                if tile_bytes <= operand_budget:
                    block_k = c
                    break
    single_k = (block_k >= D)
    D_pad = D if single_k else _round_up(D, block_k)
    if single_k:
        block_k = D_pad

    # --- parameter / input padding (tiny except when B or D is ragged) -------
    w_bf = w.astype(jnp.bfloat16)
    if C_pad != C:
        w_bf = jnp.pad(w_bf, ((0, 0), (0, C_pad - C)))
        b_p = jnp.pad(b.astype(jnp.float32), (0, C_pad - C),
                      constant_values=jnp.float32(-1e30))
    else:
        b_p = b.astype(jnp.float32)
    if D_pad != D:
        w_bf = jnp.pad(w_bf, ((0, D_pad - D), (0, 0)))
    b2 = b_p.reshape(1, C_pad)

    x_p = x.astype(jnp.float32)
    if B_pad != B or D_pad != D:
        x_p = jnp.pad(x_p, ((0, B_pad - B), (0, D_pad - D)))

    # --- pallas_call ----------------------------------------------------------
    if single_k:
        out = pl.pallas_call(
            _logreg_kernel_single,
            out_shape=jax.ShapeDtypeStruct((B_pad, C_pad), jnp.float32),
            grid_spec=pltpu.PrefetchScalarGridSpec(
                num_scalar_prefetch=0,
                grid=(B_pad // block_b,),
                in_specs=[
                    pl.BlockSpec((block_b, D_pad), lambda i: (i, 0)),   # x tile
                    pl.BlockSpec((D_pad, C_pad), lambda i: (0, 0)),     # W (resident)
                    pl.BlockSpec((1, C_pad), lambda i: (0, 0)),         # bias
                ],
                out_specs=pl.BlockSpec((block_b, C_pad), lambda i: (i, 0)),
            ),
            compiler_params=pltpu.CompilerParams(
                dimension_semantics=("parallel",),
                vmem_limit_bytes=vmem_limit,
            ),
        )(x_p, w_bf, b2)
    else:
        out = pl.pallas_call(
            _logreg_kernel_ktiled,
            out_shape=jax.ShapeDtypeStruct((B_pad, C_pad), jnp.float32),
            grid_spec=pltpu.PrefetchScalarGridSpec(
                num_scalar_prefetch=0,
                grid=(B_pad // block_b, D_pad // block_k),
                in_specs=[
                    pl.BlockSpec((block_b, block_k), lambda i, k: (i, k)),  # x tile
                    pl.BlockSpec((block_k, C_pad), lambda i, k: (k, 0)),    # W tile
                    pl.BlockSpec((1, C_pad), lambda i, k: (0, 0)),          # bias
                ],
                out_specs=pl.BlockSpec((block_b, C_pad), lambda i, k: (i, 0)),
            ),
            compiler_params=pltpu.CompilerParams(
                dimension_semantics=("parallel", "arbitrary"),
                vmem_limit_bytes=vmem_limit,
            ),
        )(x_p, w_bf, b2)

    return out[:B, :C]


if __name__ == "__main__":
    # Small shapes consistent with nn.Linear(input_size, num_classes).
    batch, input_size, num_classes = 8, 32, 16

    key = jax.random.PRNGKey(0)
    kx, kw, kb = jax.random.split(key, 3)

    x = jax.random.normal(kx, (batch, input_size), dtype=jnp.float32)
    bound = 1.0 / (input_size ** 0.5)
    w = jax.random.uniform(kw, (input_size, num_classes), jnp.float32,
                           minval=-bound, maxval=bound)
    b = jax.random.uniform(kb, (num_classes,), jnp.float32,
                           minval=-bound, maxval=bound)

    out = jax.block_until_ready(logistic_regression_forward(x, w, b))

    # Reference check (loose tolerance: bf16 MXU operands + approx reciprocal).
    ref = jax.nn.softmax(x @ w + b, axis=1)
    assert out.shape == (batch, num_classes)
    assert jnp.allclose(out, ref, atol=2e-2, rtol=2e-2), float(jnp.max(jnp.abs(out - ref)))
    assert jnp.allclose(jnp.sum(out, axis=1), 1.0, atol=5e-3)

    print("KERNEL_OK")
</pallas_src>

<mosaic_0001>
module attributes {stable_mosaic.version = 11 : i64} {
  func.func @_logreg_kernel_single(%arg0: i32, %arg1: memref<8x32xf32, #tpu.memory_space<vmem>>, %arg2: memref<32x128xbf16, #tpu.memory_space<vmem>>, %arg3: memref<1x128xf32, #tpu.memory_space<vmem>>, %arg4: memref<8x128xf32, #tpu.memory_space<vmem>>) attributes {dimension_semantics = [#tpu.dimension_semantics<parallel>], iteration_bounds = array<i64: 1>, scalar_prefetch = 0 : i64, scratch_operands = 0 : i64, tpu.core_type = #tpu.core_type<tc>, window_params = [{transform_indices = @transform_0, window_bounds = array<i64: 8, 32>}, {pipeline_mode = #tpu.pipeline_mode<synchronous>, transform_indices = @transform_1, window_bounds = array<i64: 32, 128>}, {pipeline_mode = #tpu.pipeline_mode<synchronous>, transform_indices = @transform_2, window_bounds = array<i64: 1, 128>}, {transform_indices = @transform_3, window_bounds = array<i64: 8, 128>}]} {
    %c0 = arith.constant 0 : index
    %c0_0 = arith.constant 0 : index
    %0 = vector.load %arg1[%c0, %c0_0] : memref<8x32xf32, #tpu.memory_space<vmem>>, vector<8x32xf32>
    %1 = arith.truncf %0 : vector<8x32xf32> to vector<8x32xbf16>
    %c0_1 = arith.constant 0 : index
    %c0_2 = arith.constant 0 : index
    %2 = vector.load %arg2[%c0_1, %c0_2] : memref<32x128xbf16, #tpu.memory_space<vmem>>, vector<32x128xbf16>
    %cst = arith.constant dense<0.000000e+00> : vector<8x128xf32>
    %3 = tpu.matmul %1, %2, %cst {dimension_numbers = #tpu.dot_dimension_numbers<[1], [0], [0], [1], [0, 0, 1, 1], [], []>} : vector<8x32xbf16>, vector<32x128xbf16>, vector<8x128xf32> -> vector<8x128xf32>
    %c0_3 = arith.constant 0 : index
    %c0_4 = arith.constant 0 : index
    %4 = vector.load %arg3[%c0_3, %c0_4] : memref<1x128xf32, #tpu.memory_space<vmem>>, vector<1x128xf32>
    %5 = vector.broadcast %4 : vector<1x128xf32> to vector<8x128xf32>
    %6 = arith.addf %3, %5 : vector<8x128xf32>
    %cst_5 = arith.constant dense<0xFF800000> : vector<8xf32>
    %7 = vector.multi_reduction <maximumf>, %6, %cst_5 [1] : vector<8x128xf32> to vector<8xf32>
    %8 = vector.shape_cast %7 : vector<8xf32> to vector<8x1xf32>
    %9 = vector.broadcast %8 : vector<8x1xf32> to vector<8x128xf32>
    %10 = arith.subf %6, %9 : vector<8x128xf32>
    %11 = math.exp %10 : vector<8x128xf32>
    %cst_6 = arith.constant dense<0.000000e+00> : vector<8xf32>
    %12 = vector.multi_reduction <add>, %11, %cst_6 [1] : vector<8x128xf32> to vector<8xf32>
    %13 = vector.shape_cast %12 : vector<8xf32> to vector<8x1xf32>
    %14 = tpu.reciprocal %13 {approx = true} : vector<8x1xf32> -> vector<8x1xf32>
    %15 = vector.broadcast %14 : vector<8x1xf32> to vector<8x128xf32>
    %16 = arith.mulf %11, %15 : vector<8x128xf32>
    %c0_7 = arith.constant 0 : index
    %c0_8 = arith.constant 0 : index
    %17 = vector.load %arg4[%c0_7, %c0_8] : memref<8x128xf32, #tpu.memory_space<vmem>>, vector<8x128xf32>
    tpu.vector_store %arg4[%c0_7, %c0_8], %16 {strides = array<i32>} : memref<8x128xf32, #tpu.memory_space<vmem>>, vector<8x128xf32>,
    return
  }
  func.func @transform_0(%arg0: i32) -> (i32, i32) {
    %c0_i32 = arith.constant 0 : i32
    %c0_i32_0 = arith.constant 0 : i32
    return %arg0, %c0_i32 : i32, i32
  }
  func.func @transform_1(%arg0: i32) -> (i32, i32) {
    %c0_i32 = arith.constant 0 : i32
    %c0_i32_0 = arith.constant 0 : i32
    %c0_i32_1 = arith.constant 0 : i32
    return %c0_i32, %c0_i32_0 : i32, i32
  }
  func.func @transform_2(%arg0: i32) -> (i32, i32) {
    %c0_i32 = arith.constant 0 : i32
    %c0_i32_0 = arith.constant 0 : i32
    %c0_i32_1 = arith.constant 0 : i32
    return %c0_i32, %c0_i32_0 : i32, i32
  }
  func.func @transform_3(%arg0: i32) -> (i32, i32) {
    %c0_i32 = arith.constant 0 : i32
    %c0_i32_0 = arith.constant 0 : i32
    return %arg0, %c0_i32 : i32, i32
  }
}

</mosaic_0001>

<bundles_post_ra>
// kernel: tpu_custom_call.1
= control target key start
LH: loop header
LB: loop body
LE: loop exit
PB: predicated region body
PF: predicated region fallthrough
CT: control target
= control target key end

     0   :  { %8 = vsyncpa [#allocation3], 0  ;;  %s310_s0 = inlined_call_operand.hbm [shape: f32[8,32], index: 0, kind: input, shape index: {}]   ;;  %s311_s1 = inlined_call_operand.hbm [shape: bf16[32,128], index: 1, kind: input, shape index: {}]   ;;  %s312_s2 = inlined_call_operand.vmem [shape: f32[1,128], index: 2, kind: input, shape index: {}]   ;;  %s313_s3 = inlined_call_operand.hbm [shape: f32[8,128], index: 3, kind: output, shape index: {}]  }
   0x1   :  { %9 = vsyncpa [#allocation6], 0 }
   0x2   :  { %10 = vsyncpa [#allocation4], 0  ;;  %s237_s12 = smov [#allocation2]   ;;  %s238_s14 = smov [#allocation5]  }
   0x3   :  { %s17_s13 = sshll.u32 %s237_s12, 4  ;;  %s26_s15 = sshll.u32 %s238_s14, 4  ;;  %s18_s13 = int_to_ptr.vmem [resolvable:$true] %s17_s13  ;;  %s264_s15 = int_to_ptr.vmem [resolvable:$true] %s26_s15 }
   0x4   :  { %s165_s18 = scalar_lea.hbm %s310_s0, 128 }
   0x5   :  { %p166_p0 = scmp.ne.s32.totalorder %s310_s0, %s165_s18  ;;  %p169_p1 = scmp.lt.u32.totalorder %s165_s18, %s310_s0 }
   0x7   :  { %p171_p2 = pnand %p169_p1, %p166_p0 }
   0x9   :  { %174 = shalt.err (!%p171_p2)
}
   0xa   :  { %s175_s23 = scalar_lea.vmem %s18_s13, 128  ;;  %p180_p4 = scmp.lt.s32.totalorder %s18_s13, %s18_s13 }
   0xb   :  { %p176_p3 = scmp.ne.s32.totalorder %s18_s13, %s175_s23  ;;  %p181_p5 = scmp.lt.s32.totalorder %s175_s23, %s175_s23 }
   0xd   :  { %p182_p6 = por %p181_p5, %p180_p4 }
   0xf   :  { %p183_p7 = pnand %p182_p6, %p176_p3 }
  0x11   :  { %186 = shalt.err (!%p183_p7)
}
  0x12   :  { %20 = dma.hbm_to_vmem [thread:$0]  %s310_s0, 128, %s18_s13, [#allocation3]  }
  0x13   :  { %s187_s28 = scalar_lea.hbm %s311_s1, 256 }
  0x14   :  { %p188_p8 = scmp.ne.s32.totalorder %s311_s1, %s187_s28  ;;  %p191_p9 = scmp.lt.u32.totalorder %s187_s28, %s311_s1 }
  0x16   :  { %p193_p10 = pnand %p191_p9, %p188_p8 }
  0x18   :  { %196 = shalt.err (!%p193_p10)
}
  0x19   :  { %s197_s6 = scalar_lea.vmem %s264_s15, 256  ;;  %p202_p12 = scmp.lt.s32.totalorder %s264_s15, %s264_s15 }
  0x1a   :  { %p198_p11 = scmp.ne.s32.totalorder %s264_s15, %s197_s6  ;;  %p203_p13 = scmp.lt.s32.totalorder %s197_s6, %s197_s6 }
  0x1c   :  { %p204_p0 = por %p203_p13, %p202_p12 }
  0x1e   :  { %p205_p1 = pnand %p204_p0, %p198_p11 }
  0x20   :  { %208 = shalt.err (!%p205_p1)
}
  0x21   :  { %s239_s0 = smov 64   ;;  %s240_s7 = smov 4  }
  0x22   :  { %32 = dma.hbm_to_vmem [thread:$0]  %s311_s1, 256, %s264_s15, [#allocation6], %s239_s0, %s239_s0, %s240_s7  }
  0x23   :  { %231 = dma.done.wait [#allocation3], 128  }
  0x24   :  { %232 = vsyncadd [#allocation3], 4294967168 }
  0x25   :  { %233 = dma.done.wait [#allocation6], 256  }
  0x26   :  { %234 = vsyncadd [#allocation6], 4294967040  ;;  %v241_v0 = vmov 0.0   ;;  %vm242_vm0 = vmmov 0   ;;  %v159_v1 = vld [vmem:[#allocation5] sm:$0xff]   ;;  %v160_v2 = vld [vmem:[#allocation5 + $0x8] sm:$0xff]  }
  0x27   :  { %144 = vmatprep.subr.bf16.mxu0 %v241_v0  ;;  %148 = vmatprep.mubr.msk.bf16.mxu0 %vm242_vm0, %v241_v0  ;;  %v42_v3 = vld [vmem:[#allocation2] sm:$0xff]  ;;  %vm67_vm1 = vcmask 261120   ;;  %s243_s1 = smov [#allocation7]  }
  0x28   :  { %145 = vmatpush3.bf16.msra.mxu0 %v159_v1  ;;  %v43_v4 = vpack.c.bf16 %v42_v3, %v42_v3  ;;  %v137_v5 = vld [vmem:[%s312_s2] ss:$0 sm:$0xff]  ;;  %s127_s12 = sshll.u32 %s243_s1, 4  ;;  %s128_s12 = int_to_ptr.vmem [resolvable:$true] %s127_s12 }
  0x29   :  { %146 = vmatprep.subr.bf16.mxu0 %v241_v0  ;;  %s209_s2 = scalar_lea.vmem %s128_s12, 128  ;;  %p214_p3 = scmp.lt.s32.totalorder %s128_s12, %s128_s12 }
  0x2a   :  { %p210_p2 = scmp.ne.s32.totalorder %s128_s12, %s209_s2  ;;  %p215_p4 = scmp.lt.s32.totalorder %s209_s2, %s209_s2 }
  0x2c   :  { %147 = vmatpush3.bf16.msra.mxu0 %v160_v2  ;;  %p216_p5 = por %p215_p4, %p214_p3 }
  0x2e   :  { %p217_p6 = pnand %p216_p5, %p210_p2 }
  0x2f   :  { %149 = vmatmul.mubr.msk.bf16.vlgmr.msra.gmra.mrb[0].mxu0 %vm67_vm1, %v43_v4 }
 0x102   :  { %v105_v6 = vpop.f32.mrb[0].mxu0 }
 0x103   :  { %v106_v7 = vadd.f32 %v137_v5, %v105_v6  ;;  %v150_v8 = vpop.f32.mrb[1].mxu0 }
 0x104   :  { %v108_v9 = vpop.f32.mrb[2].mxu0 }
 0x105   :  { %111 = vmax.xlane.f32.xlu0 %v106_v7  ;;  %v151_v10 = vpop.f32.mrb[3].mxu0 }
 0x192   :  { %v112_v11 = vpop.xlane.xlu0 %111 }
 0x193   :  { %v113_v12 = vsub.f32 %v106_v7, %v112_v11 }
 0x195   :  { %v114_v13 = vmul.f32 1.442695, %v113_v12 }
 0x197   :  { %161 = vpow2.f32 %v114_v13 }
 0x1a1   :  { %v162_v14 = vpop.eup %161 }
 0x1a2   :  { %116 = vadd.xlane.f32.xlu0 %v162_v14 }
 0x22f   :  { %v117_v15 = vpop.xlane.xlu0 %116 }
 0x230   :  { %163 = vrcp.f32 %v117_v15 }
 0x23a   :  { %v164_v16 = vpop.eup %163 }
 0x23b   :  { %v119_v17 = vmul.f32 %v164_v16, %v162_v14 }
 0x23d   :  { %120 = vst [vmem:[#allocation7] sm:$0xff] %v119_v17 }
 0x23e   :  { %220 = shalt.err (!%p217_p6)
}
 0x23f   :  { %s221_s15 = scalar_lea.hbm %s313_s3, 128 }
 0x240   :  { %p222_p7 = scmp.ne.s32.totalorder %s313_s3, %s221_s15  ;;  %p225_p8 = scmp.lt.u32.totalorder %s221_s15, %s313_s3 }
 0x242   :  { %p227_p9 = pnand %p225_p8, %p222_p7 }
 0x244   :  { %230 = shalt.err (!%p227_p9)
}
 0x245   :  { %130 = dma.vmem_to_hbm [thread:$0]  %s128_s12, 128, %s313_s3, [#allocation4]  }
 0x246   :  { %235 = dma.done.wait [#allocation4], 128  }
 0x247   :  { %236 = vsyncadd [#allocation4], 4294967168 }
 0x248   :  { %134 = vsyncpa [#allocation3], 1 }
 0x249   :  { %135 = vsyncpa [#allocation6], 1 }
 0x24a   :  { %136 = vsyncpa [#allocation4], 1 }

</bundles_post_ra>
